<compile_context>
chip_gen: v5e
topology: v5e:2x2
jax: 0.10.0
libtpu: 0.0.40
codegen_flags: <defaults>
</compile_context>

<pallas_src>
import functools

import jax
import jax.numpy as jnp
from jax.experimental import pallas as pl
from jax.experimental.pallas import tpu as pltpu


def _round_up(x, m):
    return ((x + m - 1) // m) * m


@functools.lru_cache(maxsize=None)
def _vmem_budget_and_limit():
    """Generation-aware (tile-selection VMEM budget, vmem_limit_bytes)."""
    try:
        cap = int(pltpu.get_tpu_info().vmem_capacity_bytes)
    except Exception:  # non-TPU tracing / API variance: stay conservative
        cap = 64 * 1024 * 1024
    if cap >= 100 * 1024 * 1024:          # v5e / v6e: 128 MiB physical VMEM
        return 48 * 1024 * 1024, 96 * 1024 * 1024
    # v7x-class: 64 MiB physical, shared by two TensorCores -> stay modest.
    return 20 * 1024 * 1024, 30 * 1024 * 1024


def _choose_tiles(B, T8, D, itemsize, use_weights, budget):
    """Pick (b_blk, t_blk): shrink the batch block before the T block so the
    contraction depth K = t_blk stays large; account the weight tile at its
    real lane-padded (x128) VMEM footprint."""
    t_blk = min(T8, 1024)                 # T8 is already a multiple of 8
    b_blk = min(B, 8)

    def est(bb, tb):
        inputs = 2 * 2 * bb * tb * D * itemsize              # r, i; 2 buffers
        weights = (2 * bb * tb * 128 * 4) if use_weights else 0   # lane-padded
        outputs = 2 * 2 * bb * D * D * 4                      # 2 f32 outs, 2 bufs
        return inputs + weights + outputs

    while est(b_blk, t_blk) > budget and b_blk > 1:
        b_blk = max(1, b_blk // 2)
    while est(b_blk, t_blk) > budget and t_blk > 256:
        t_blk = max(256, _round_up(t_blk // 2, 8))
    while est(b_blk, t_blk) > budget and t_blk > 8:           # huge-D last resort
        t_blk = max(8, _round_up(t_blk // 2, 8))

    # Megacore (dual-TC chips): prefer >= 2 and an even number of parallel
    # grid steps along the batch axis whenever the batch size allows it.
    if B > 1:
        def n_steps(bb):
            return -(-B // bb)
        if n_steps(b_blk) < 2:
            b_blk = (B + 1) // 2
        if n_steps(b_blk) > 1 and n_steps(b_blk) % 2 == 1:
            for cand in range(b_blk - 1, 0, -1):
                if n_steps(cand) % 2 == 0:
                    b_blk = cand
                    break
    return b_blk, t_blk


def _mixture_kernel(*refs, use_weights: bool, inv_t: float, b_blk: int,
                    transpose_in_kernel: bool):
    if use_weights:
        r_ref, i_ref, w_ref, or_ref, oi_ref = refs
    else:
        r_ref, i_ref, or_ref, oi_ref = refs
        w_ref = None

    k = pl.program_id(1)
    nk = pl.num_programs(1)

    @pl.when(k == 0)
    def _init():
        or_ref[...] = jnp.zeros_like(or_ref)
        oi_ref[...] = jnp.zeros_like(oi_ref)

    r = r_ref[...]                        # (b_blk, t_blk, D), input dtype
    im = i_ref[...]

    if use_weights:
        # (b_blk, t_blk, 1) weights; lane-broadcast multiply in the input
        # dtype (bf16 stays bf16 -- no full-tile f32 round-trip).
        w = w_ref[...].astype(r.dtype)
        wr = w * r
        wi = w * im
    else:
        wr = r                            # uniform 1/T applied at finalize
        wi = im

    # Three direct K = t_blk MXU contractions, f32 accumulation into the
    # resident output blocks (no operand staging through VMEM scratch).
    or_ref[...] += (
        jnp.einsum('btd,bte->bde', wr, r, preferred_element_type=jnp.float32)
        + jnp.einsum('btd,bte->bde', wi, im, preferred_element_type=jnp.float32))
    # G accumulates directly in the imag output block; out_imag = G - G^T.
    oi_ref[...] += jnp.einsum('btd,bte->bde', wi, r,
                              preferred_element_type=jnp.float32)

    if (not use_weights) or transpose_in_kernel:
        @pl.when(k == nk - 1)
        def _finalize():
            if not use_weights:
                or_ref[...] *= jnp.float32(inv_t)
            if transpose_in_kernel:
                # Antisymmetric combine on the XLU, one (D, D) slab per batch.
                for bb in range(b_blk):
                    g = oi_ref[bb]
                    d = g - g.T
                    oi_ref[bb] = d if use_weights else d * jnp.float32(inv_t)
            elif not use_weights:
                oi_ref[...] *= jnp.float32(inv_t)


@functools.partial(jax.jit, static_argnames=("use_weights",))
def complex_mixture(input_real, input_imag, weight=None, *, use_weights=True):
    """Pallas implementation of ComplexMixture.forward.

    input_real, input_imag: (B, T, D) float arrays.
    weight: (B, T) or (B, T, 1); required iff use_weights=True.
    Returns [output_r, output_i], each (B, D, D) float32.
    """
    B, T, D = input_real.shape
    dtype = input_real.dtype
    itemsize = jnp.dtype(dtype).itemsize

    budget, vmem_limit = _vmem_budget_and_limit()
    T8 = _round_up(max(T, 1), 8)
    b_blk, t_blk = _choose_tiles(B, T8, D, itemsize, use_weights, budget)
    T_pad = _round_up(T, t_blk)
    B_pad = _round_up(B, b_blk)

    def pad_bt(x):
        pads = ((0, B_pad - B), (0, T_pad - T)) + ((0, 0),) * (x.ndim - 2)
        return jnp.pad(x, pads)           # zero padding contributes nothing

    r = pad_bt(input_real)
    im = pad_bt(input_imag.astype(dtype))

    operands = [r, im]
    in_specs = [
        pl.BlockSpec((b_blk, t_blk, D), lambda b, k: (b, k, 0)),
        pl.BlockSpec((b_blk, t_blk, D), lambda b, k: (b, k, 0)),
    ]

    if use_weights:
        if weight is None:
            raise ValueError("use_weights=True requires a weight input")
        w = weight.astype(jnp.float32)
        if w.ndim == 2:
            w = w[..., None]              # (B, T, 1): sublane-major, lane-bcast
        w = pad_bt(w)
        operands.append(w)
        in_specs.append(pl.BlockSpec((b_blk, t_blk, 1), lambda b, k: (b, k, 0)))

    # In-kernel antisymmetric finalize only when the (D, D) transpose is on
    # safely-lowering 128-aligned tiles; otherwise fuse G - G^T in XLA below.
    transpose_in_kernel = (D % 128 == 0)

    out_shape = (
        jax.ShapeDtypeStruct((B_pad, D, D), jnp.float32),
        jax.ShapeDtypeStruct((B_pad, D, D), jnp.float32),
    )
    out_specs = [
        pl.BlockSpec((b_blk, D, D), lambda b, k: (b, 0, 0)),
        pl.BlockSpec((b_blk, D, D), lambda b, k: (b, 0, 0)),
    ]

    kernel = functools.partial(
        _mixture_kernel, use_weights=use_weights, inv_t=1.0 / T, b_blk=b_blk,
        transpose_in_kernel=transpose_in_kernel)

    cost = pl.CostEstimate(
        flops=int(6 * B * T * D * D),     # 3 matmuls (antisymmetry saves 25%)
        transcendentals=0,
        bytes_accessed=int(2 * B * T * D * itemsize
                           + (B * T * 4 if use_weights else 0)
                           + 2 * B * D * D * 4),
    )

    out_r, out_g = pl.pallas_call(
        kernel,
        out_shape=out_shape,
        grid_spec=pltpu.PrefetchScalarGridSpec(
            num_scalar_prefetch=0,
            grid=(B_pad // b_blk, T_pad // t_blk),
            in_specs=in_specs,
            out_specs=out_specs,
        ),
        compiler_params=pltpu.CompilerParams(
            dimension_semantics=("parallel", "arbitrary"),
            vmem_limit_bytes=vmem_limit,
        ),
        cost_estimate=cost,
    )(*operands)

    out_r = out_r[:B]
    out_g = out_g[:B]
    if transpose_in_kernel:
        out_i = out_g                     # kernel already wrote G - G^T
    else:
        # Fused transpose+subtract over (B, D, D) f32 in XLA (tiny vs T*D stream).
        out_i = out_g - jnp.swapaxes(out_g, -1, -2)
    return [out_r, out_i]


def _reference(input_real, input_imag, weight=None, use_weights=True):
    """Plain-JAX transcription of the PyTorch forward, for verification."""
    r = input_real[..., :, None]          # (B, T, D, 1)
    i = input_imag[..., :, None]
    rt = input_real[..., None, :]         # (B, T, 1, D)
    it = input_imag[..., None, :]
    out_real = r @ rt + i @ it            # (B, T, D, D)
    out_imag = i @ rt - r @ it
    if not use_weights:
        return [out_real.mean(axis=1), out_imag.mean(axis=1)]
    if weight.ndim == 2:
        w = weight[..., None, None]
    else:
        w = weight[..., None]
    out_real = out_real.astype(jnp.float32) * w.astype(jnp.float32)
    out_imag = out_imag.astype(jnp.float32) * w.astype(jnp.float32)
    return [out_real.sum(axis=1), out_imag.sum(axis=1)]


if __name__ == "__main__":
    B, T, D = 2, 8, 32
    key = jax.random.PRNGKey(0)
    k1, k2, k3 = jax.random.split(key, 3)
    input_real = jax.random.normal(k1, (B, T, D), dtype=jnp.float32)
    input_imag = jax.random.normal(k2, (B, T, D), dtype=jnp.float32)
    weight = jax.nn.softmax(jax.random.normal(k3, (B, T), dtype=jnp.float32), axis=-1)

    # use_weights=True path
    out_r, out_i = complex_mixture(input_real, input_imag, weight, use_weights=True)
    jax.block_until_ready(out_r)
    jax.block_until_ready(out_i)
    ref_r, ref_i = _reference(input_real, input_imag, weight, use_weights=True)
    assert jnp.allclose(out_r, ref_r, atol=1e-5, rtol=1e-5)
    assert jnp.allclose(out_i, ref_i, atol=1e-5, rtol=1e-5)

    # use_weights=False path (mean over seq axis, no weight array DMA)
    out_r2, out_i2 = complex_mixture(input_real, input_imag, use_weights=False)
    jax.block_until_ready(out_r2)
    ref_r2, ref_i2 = _reference(input_real, input_imag, use_weights=False)
    assert jnp.allclose(out_r2, ref_r2, atol=1e-5, rtol=1e-5)
    assert jnp.allclose(out_i2, ref_i2, atol=1e-5, rtol=1e-5)

    # Padding path: B / T not aligned to the chosen blocks.
    B2, T2, D2 = 3, 5, 32
    k4, k5, k6 = jax.random.split(jax.random.PRNGKey(1), 3)
    r2 = jax.random.normal(k4, (B2, T2, D2), dtype=jnp.float32)
    i2 = jax.random.normal(k5, (B2, T2, D2), dtype=jnp.float32)
    w2 = jax.nn.softmax(jax.random.normal(k6, (B2, T2), dtype=jnp.float32), axis=-1)[..., None]
    out_r3, out_i3 = complex_mixture(r2, i2, w2, use_weights=True)
    jax.block_until_ready(out_r3)
    ref_r3, ref_i3 = _reference(r2, i2, w2, use_weights=True)
    assert jnp.allclose(out_r3, ref_r3, atol=1e-5, rtol=1e-5)
    assert jnp.allclose(out_i3, ref_i3, atol=1e-5, rtol=1e-5)

    # bf16 path (weights applied in bf16 inside the kernel; loose tolerance).
    r_bf = input_real.astype(jnp.bfloat16)
    i_bf = input_imag.astype(jnp.bfloat16)
    out_r4, out_i4 = complex_mixture(r_bf, i_bf, weight, use_weights=True)
    jax.block_until_ready(out_r4)
    ref_r4, ref_i4 = _reference(r_bf.astype(jnp.float32), i_bf.astype(jnp.float32),
                                weight, use_weights=True)
    assert jnp.allclose(out_r4, ref_r4, atol=5e-2, rtol=5e-2)
    assert jnp.allclose(out_i4, ref_i4, atol=5e-2, rtol=5e-2)

    print("KERNEL_OK")
</pallas_src>

<mosaic_0001>
module attributes {stable_mosaic.version = 11 : i64} {
  func.func @_mixture_kernel(%arg0: i32, %arg1: i32, %arg2: memref<1x8x32xf32, #tpu.memory_space<vmem>>, %arg3: memref<1x8x32xf32, #tpu.memory_space<vmem>>, %arg4: memref<1x8x1xf32, #tpu.memory_space<vmem>>, %arg5: memref<1x32x32xf32, #tpu.memory_space<vmem>>, %arg6: memref<1x32x32xf32, #tpu.memory_space<vmem>>) attributes {dimension_semantics = [#tpu.dimension_semantics<parallel>, #tpu.dimension_semantics<arbitrary>], iteration_bounds = array<i64: 2, 1>, scalar_prefetch = 0 : i64, scratch_operands = 0 : i64, tpu.core_type = #tpu.core_type<tc>, window_params = [{transform_indices = @transform_0, window_bounds = array<i64: 1, 8, 32>}, {transform_indices = @transform_1, window_bounds = array<i64: 1, 8, 32>}, {transform_indices = @transform_2, window_bounds = array<i64: 1, 8, 1>}, {transform_indices = @transform_3, window_bounds = array<i64: 1, 32, 32>}, {transform_indices = @transform_4, window_bounds = array<i64: 1, 32, 32>}]} {
    %c0_i32 = arith.constant 0 : i32
    %0 = arith.cmpi eq, %arg1, %c0_i32 : i32
    %1 = arith.extui %0 : i1 to i32
    %c0_i32_0 = arith.constant 0 : i32
    %2 = arith.cmpi ne, %1, %c0_i32_0 : i32
    scf.if %2 {
      %cst_23 = arith.constant 0.000000e+00 : f32
      %20 = vector.broadcast %cst_23 : f32 to vector<1x32x32xf32>
      %c0_24 = arith.constant 0 : index
      %c0_25 = arith.constant 0 : index
      %c0_26 = arith.constant 0 : index
      %21 = vector.load %arg5[%c0_24, %c0_25, %c0_26] : memref<1x32x32xf32, #tpu.memory_space<vmem>>, vector<1x32x32xf32>
      tpu.vector_store %arg5[%c0_24, %c0_25, %c0_26], %20 {strides = array<i32>} : memref<1x32x32xf32, #tpu.memory_space<vmem>>, vector<1x32x32xf32>,
      %cst_27 = arith.constant 0.000000e+00 : f32
      %22 = vector.broadcast %cst_27 : f32 to vector<1x32x32xf32>
      %c0_28 = arith.constant 0 : index
      %c0_29 = arith.constant 0 : index
      %c0_30 = arith.constant 0 : index
      %23 = vector.load %arg6[%c0_28, %c0_29, %c0_30] : memref<1x32x32xf32, #tpu.memory_space<vmem>>, vector<1x32x32xf32>
      tpu.vector_store %arg6[%c0_28, %c0_29, %c0_30], %22 {strides = array<i32>} : memref<1x32x32xf32, #tpu.memory_space<vmem>>, vector<1x32x32xf32>,
    } else {
    }
    %c0 = arith.constant 0 : index
    %c0_1 = arith.constant 0 : index
    %c0_2 = arith.constant 0 : index
    %3 = vector.load %arg2[%c0, %c0_1, %c0_2] : memref<1x8x32xf32, #tpu.memory_space<vmem>>, vector<1x8x32xf32>
    %c0_3 = arith.constant 0 : index
    %c0_4 = arith.constant 0 : index
    %c0_5 = arith.constant 0 : index
    %4 = vector.load %arg3[%c0_3, %c0_4, %c0_5] : memref<1x8x32xf32, #tpu.memory_space<vmem>>, vector<1x8x32xf32>
    %c0_6 = arith.constant 0 : index
    %c0_7 = arith.constant 0 : index
    %c0_8 = arith.constant 0 : index
    %5 = vector.load %arg4[%c0_6, %c0_7, %c0_8] : memref<1x8x1xf32, #tpu.memory_space<vmem>>, vector<1x8x1xf32>
    %6 = vector.broadcast %5 : vector<1x8x1xf32> to vector<1x8x32xf32>
    %7 = arith.mulf %6, %3 : vector<1x8x32xf32>
    %8 = vector.broadcast %5 : vector<1x8x1xf32> to vector<1x8x32xf32>
    %9 = arith.mulf %8, %4 : vector<1x8x32xf32>
    %c0_9 = arith.constant 0 : index
    %c0_10 = arith.constant 0 : index
    %c0_11 = arith.constant 0 : index
    %10 = vector.load %arg5[%c0_9, %c0_10, %c0_11] : memref<1x32x32xf32, #tpu.memory_space<vmem>>, vector<1x32x32xf32>
    "tpu.trace_start"() <{level = 10 : i32, message = "btd,bte->bde"}> : () -> ()
    %cst = arith.constant dense<0.000000e+00> : vector<1x32x32xf32>
    %11 = tpu.matmul %7, %3, %cst {dimension_numbers = #tpu.dot_dimension_numbers<[1], [1], [2], [2], [0, 0, 0, 2, 1, 2], [0], [0]>} : vector<1x8x32xf32>, vector<1x8x32xf32>, vector<1x32x32xf32> -> vector<1x32x32xf32>
    %cst_12 = arith.constant dense<0.000000e+00> : vector<1x32x32xf32>
    %12 = tpu.matmul %9, %4, %cst_12 {dimension_numbers = #tpu.dot_dimension_numbers<[1], [1], [2], [2], [0, 0, 0, 2, 1, 2], [0], [0]>} : vector<1x8x32xf32>, vector<1x8x32xf32>, vector<1x32x32xf32> -> vector<1x32x32xf32>
    "tpu.trace_stop"() : () -> ()
    %13 = arith.addf %11, %12 : vector<1x32x32xf32>
    %14 = arith.addf %10, %13 : vector<1x32x32xf32>
    %c0_13 = arith.constant 0 : index
    %c0_14 = arith.constant 0 : index
    %c0_15 = arith.constant 0 : index
    %15 = vector.load %arg5[%c0_13, %c0_14, %c0_15] : memref<1x32x32xf32, #tpu.memory_space<vmem>>, vector<1x32x32xf32>
    tpu.vector_store %arg5[%c0_13, %c0_14, %c0_15], %14 {strides = array<i32>} : memref<1x32x32xf32, #tpu.memory_space<vmem>>, vector<1x32x32xf32>,
    %c0_16 = arith.constant 0 : index
    %c0_17 = arith.constant 0 : index
    %c0_18 = arith.constant 0 : index
    %16 = vector.load %arg6[%c0_16, %c0_17, %c0_18] : memref<1x32x32xf32, #tpu.memory_space<vmem>>, vector<1x32x32xf32>
    "tpu.trace_start"() <{level = 10 : i32, message = "btd,bte->bde"}> : () -> ()
    %cst_19 = arith.constant dense<0.000000e+00> : vector<1x32x32xf32>
    %17 = tpu.matmul %9, %3, %cst_19 {dimension_numbers = #tpu.dot_dimension_numbers<[1], [1], [2], [2], [0, 0, 0, 2, 1, 2], [0], [0]>} : vector<1x8x32xf32>, vector<1x8x32xf32>, vector<1x32x32xf32> -> vector<1x32x32xf32>
    "tpu.trace_stop"() : () -> ()
    %18 = arith.addf %16, %17 : vector<1x32x32xf32>
    %c0_20 = arith.constant 0 : index
    %c0_21 = arith.constant 0 : index
    %c0_22 = arith.constant 0 : index
    %19 = vector.load %arg6[%c0_20, %c0_21, %c0_22] : memref<1x32x32xf32, #tpu.memory_space<vmem>>, vector<1x32x32xf32>
    tpu.vector_store %arg6[%c0_20, %c0_21, %c0_22], %18 {strides = array<i32>} : memref<1x32x32xf32, #tpu.memory_space<vmem>>, vector<1x32x32xf32>,
    return
  }
  func.func @transform_0(%arg0: i32, %arg1: i32) -> (i32, i32, i32) {
    %c0_i32 = arith.constant 0 : i32
    %c0_i32_0 = arith.constant 0 : i32
    return %arg0, %arg1, %c0_i32 : i32, i32, i32
  }
  func.func @transform_1(%arg0: i32, %arg1: i32) -> (i32, i32, i32) {
    %c0_i32 = arith.constant 0 : i32
    %c0_i32_0 = arith.constant 0 : i32
    return %arg0, %arg1, %c0_i32 : i32, i32, i32
  }
  func.func @transform_2(%arg0: i32, %arg1: i32) -> (i32, i32, i32) {
    %c0_i32 = arith.constant 0 : i32
    %c0_i32_0 = arith.constant 0 : i32
    return %arg0, %arg1, %c0_i32 : i32, i32, i32
  }
  func.func @transform_3(%arg0: i32, %arg1: i32) -> (i32, i32, i32) {
    %c0_i32 = arith.constant 0 : i32
    %c0_i32_0 = arith.constant 0 : i32
    %c0_i32_1 = arith.constant 0 : i32
    return %arg0, %c0_i32, %c0_i32_0 : i32, i32, i32
  }
  func.func @transform_4(%arg0: i32, %arg1: i32) -> (i32, i32, i32) {
    %c0_i32 = arith.constant 0 : i32
    %c0_i32_0 = arith.constant 0 : i32
    %c0_i32_1 = arith.constant 0 : i32
    return %arg0, %c0_i32, %c0_i32_0 : i32, i32, i32
  }
}

</mosaic_0001>

<bundles_post_ra>
// kernel: complex_mixture.1
= control target key start
LH: loop header
LB: loop body
LE: loop exit
PB: predicated region body
PF: predicated region fallthrough
CT: control target
= control target key end

     0   :  { %10 = vsyncpa [#allocation3], 0  ;;  %s1122_s0 = inlined_call_operand.vmem [shape: f32[2,8,32], index: 0, kind: input, shape index: {}]   ;;  %s1123_s1 = inlined_call_operand.hbm [shape: f32[2,8,32], index: 1, kind: input, shape index: {}]   ;;  %s1124_s2 = inlined_call_operand.vmem [shape: f32[2,8,1], index: 2, kind: input, shape index: {}]   ;;  %s1125_s3 = inlined_call_operand.hbm [shape: f32[2,32,32], index: 3, kind: output, shape index: {0}]   ;;  %s1126_s4 = inlined_call_operand.vmem [shape: f32[2,32,32], index: 4, kind: output, shape index: {1}]  }
   0x1   :  { %12 = vsyncpa [#allocation3 + $0x1], 0 }
   0x2   :  { %13 = vsyncpa [#allocation4], 0 }
   0x3   :  { %15 = vsyncpa [#allocation4 + $0x1], 0  ;;  %s929_s15 = smov 0   ;;  %s931_s16 = smov 0  }
   0x4   :  { %s933_s17 = smov 0   ;;  %s935_s18 = smov 0  }
   0x5   :  { %s937_s19 = smov 0   ;;  %s939_s20 = smov 0  }
   0x6 LB: > { %s684_s21 = sadd.s32 4294967295, %s898_s20   ;;  %s685_s22 = sadd.s32 4294967294, %s898_s20   ;;  %s898_s20 = sphi %s939_s20, %s21_s20   ;;  %s894_s19 = sphi %s937_s19, %s1135_s19   ;;  %s890_s18 = sphi %s935_s18, %s1134_s18   ;;  %s886_s17 = sphi %s933_s17, %s1133_s17   ;;  %s882_s16 = sphi %s931_s16, %s1132_s16   ;;  %s878_s15 = sphi %s929_s15, %s1131_s15  }
   0x7   : > { %s33_s23 = sadd.s32 1, %s894_s19  ;;  %s70_s24 = sadd.s32 1, %s886_s17 }
   0x8   : > { %p35_p0 = scmp.ge.s32.totalorder %s33_s23, 2  ;;  %p77_p1 = scmp.ne.s32.totalorder %s886_s17, %s882_s16 }
   0x9   : > { %p78_p2 = scmp.eq.s32.totalorder %s898_s20, 0  ;;  %p83_p3 = scmp.ne.s32.totalorder %s882_s16, %s878_s15 }
   0xa   : > { %s1137_s23 = smov (%p35_p0, %s33_s23), 0  ;;  %p84_p5 = scmp.eq.s32.totalorder %s684_s21, 0 }
   0xb   : > { %p970_p4 = por %p78_p2, %p77_p1  ;;  %s65_s26 = ssub.s32 %s894_s19, %s1137_s23 }
   0xc   : > { %p135_p6 = scmp.eq.s32.totalorder %s684_s21, 1  ;;  %p68_p7 = scmp.eq.s32.totalorder %s65_s26, 0 }
   0xd   : > { %p976_p8 = por %p84_p5, %p83_p3  ;;  %p141_p10 = scmp.eq.s32.totalorder %s685_s22, 1 }
   0xe   : > { %p980_p9 = por %p135_p6, %p77_p1  ;;  %p687_p12 = scmp.ge.s32.totalorder %s898_s20, 2 }
   0xf   : > { %s985_s29 = scalar_select %p68_p7, %s886_s17, %s70_s24  }
  0x10   : > { %p987_p11 = por %p141_p10, %p83_p3  ;;  %p731_p13 = scmp.lt.s32.totalorder %s898_s20, 2 }
  0x11   : > { %s197_s5 = sand.u32 1, %s886_s17   ;;  %s689_s7 = sshll.u32 %s894_s19, 3 }
  0x12   : > { %s688_s6 = sshll.u32 %s197_s5, 3  ;;  %s206_s10 = scalar_lea.hbm %s1123_s1, %s689_s7 }
  0x13   : > { %s201_s11 = scalar_lea.vmem [#allocation2], %s688_s6  ;;  %s208_s13 = sshll.u32 %s206_s10, 4  ;;  %s209_s13 = int_to_ptr.hbm [resolvable:$true] %s208_s13 }
  0x14   : > { %s210_s12 = sshll.u32 %s201_s11, 4  ;;  %p724_p0 = pnand %p731_p13, %p970_p4  ;;  %s211_s12 = int_to_ptr.vmem [resolvable:$true] %s210_s12 }
  0x15   : > { %p690_p1 = scmp.ge.s32.totalorder %s898_s20, 1  ;;  %p225_p2 = scmp.lt.s32.totalorder %s898_s20, 3 }
  0x16   : > { %s198_s14 = scalar_lea.sflag [#allocation3], %s197_s5 }
  0x17   : > { %726 = dma.hbm_to_vmem [thread:$0]  (!%p724_p0), %s209_s13, 128, %s211_s12, %s198_s14  }
  0x18   : > { %p226_p3 = pnand %p690_p1, %p225_p2 }
  0x19   : > { %s1003_s21 = sand.u32 (!%p226_p3), 1, %s882_s16  }
  0x1a   : > { %229 = sbr.rel (%p226_p3) target bundleno = 485 (0x1e5), region = 32  ;;  %s691_s22 = sshll.u32 (!%p226_p3), %s1003_s21, 3 }
  0x1b   : > { %s232_s24 = scalar_lea.sflag (!%p226_p3), [#allocation3], %s1003_s21  ;;  %s235_s26 = scalar_lea.vmem (!%p226_p3), [#allocation2], %s691_s22 }
  0x1f   : > { %869 = dma.done.wait (%p976_p8), %s232_s24, 128  }
  0x20   : > { %871 = vsyncadd (%p976_p8), %s232_s24, 4294967168  ;;  %p280_p4 = scmp.lt.s32.totalorder %s890_s18, 1  ;;  %v900_v0 = vmov 0   ;;  %v313_v3 = vld [vmem:[%s235_s26] sm:$0xff]  ;;  %vm358_vm0 = vcmask 64512   ;;  %s692_s27 = sshll.u32 %s1003_s21, 5 }
  0x21   : > { %785 = vset.pattern.permute.xlu0 %v900_v0  ;;  %386 = vmatpush.msra.mxu0 %v313_v3  ;;  %vm303_vm1 = vcmask 261120   ;;  %s1036_s13 = scalar_lea.vmem [#allocation5], %s692_s27  ;;  %v901_v15 = vmov 0.0   ;;  %s715_s26 = sshll.u32 %s890_s18, 5 }
  0x22   : > { %s1013_s25 = scalar_select %p280_p4, %s890_s18, 1  ;;  %716 = vmatpush.msra.mxu3 %v313_v3  ;;  %304 = vst.msk [vmem:[%s1036_s13] sm:$0xff] %vm303_vm1, %v901_v15 }
  0x23   : > { %305 = vst.msk [vmem:[%s1036_s13 + $0x8] sm:$0xff] %vm303_vm1, %v901_v15  ;;  %s540_s6 = scalar_lea.hbm %s1125_s3, %s715_s26  ;;  %s541_s7 = sshll.u32 %s1036_s13, 4  ;;  %s542_s7 = int_to_ptr.vmem [resolvable:$true] %s541_s7 }
  0x24   : > { %s693_s5 = sshll.u32 %s1013_s25, 3  ;;  %s714_s12 = sshll.u32 %s1013_s25, 5  ;;  %306 = vst.msk [vmem:[%s1036_s13 + $0x10] sm:$0xff] %vm303_vm1, %v901_v15 }
  0x25   : > { %s286_s8 = scalar_lea.vmem %s1122_s0, %s693_s5  ;;  %s293_s11 = scalar_lea.vmem %s1124_s2, %s693_s5  ;;  %307 = vst.msk [vmem:[%s1036_s13 + $0x18] sm:$0xff] %vm303_vm1, %v901_v15 }
  0x26   : > { %v314_v1 = vld [vmem:[%s293_s11] sm:$0xff]  ;;  %s1045_s24 = scalar_lea.vmem %s1126_s4, %s714_s12  ;;  %s524_s18 = scalar_lea.sflag [#allocation4], %s1003_s21 }
  0x27   : > { %v312_v2 = vld [vmem:[%s286_s8] sm:$0xff]  ;;  %317 = vperm.xlu0 %785, %v314_v1   ;;  %308 = vst.msk [vmem:[%s1045_s24] sm:$0xff] %vm303_vm1, %v901_v15  ;;  %s543_s8 = sshll.u32 %s540_s6, 4  ;;  %s836_s12 = scalar_lea.hbm %s1125_s3, 64  ;;  %s544_s8 = int_to_ptr.hbm [resolvable:$true] %s543_s8 }
  0x28   : > { %718 = vmatpush.msra.mxu2 %v312_v2  ;;  %717 = vmatpush.msra.mxu1 %v312_v2  ;;  %309 = vst.msk [vmem:[%s1045_s24 + $0x8] sm:$0xff] %vm303_vm1, %v901_v15  ;;  %s830_s9 = sshra.s32 %s544_s8, 4  ;;  %s831_s9 = int_to_ptr.hbm [resolvable:$true] %s830_s9 }
  0x29   : > { %459 = vmatpush.msrb.mxu0 %v312_v2  ;;  %310 = vst.msk [vmem:[%s1045_s24 + $0x10] sm:$0xff] %vm303_vm1, %v901_v15  ;;  %v322_v17 = vld [vmem:[%s1036_s13] sm:$0xff]  ;;  %s832_s10 = scalar_lea.hbm %s831_s9, 32  ;;  %p837_p8 = scmp.lt.s32.totalorder %s831_s9, %s1125_s3 }
  0x2a   : > { %311 = vst.msk [vmem:[%s1045_s24 + $0x18] sm:$0xff] %vm303_vm1, %v901_v15  ;;  %v323_v24 = vld [vmem:[%s1036_s13 + $0x8] sm:$0xff]  ;;  %p833_p5 = scmp.ne.s32.totalorder %s831_s9, %s832_s10  ;;  %p838_p10 = scmp.lt.s32.totalorder %s836_s12, %s832_s10 }
  0x2b   : > { %v324_v35 = vld [vmem:[%s1036_s13 + $0x10] sm:$0xff] }
  0x2c   : > { %v325_v43 = vld [vmem:[%s1036_s13 + $0x18] sm:$0xff]  ;;  %p834_p6 = pnand %p833_p5, %p980_p9  ;;  %p839_p13 = por %p838_p10, %p837_p8 }
  0x2e   : > { %v482_v25 = vld [vmem:[%s1045_s24] sm:$0xff]  ;;  %p835_p7 = pneg %p834_p6 }
  0x2f   : > { %v483_v22 = vld [vmem:[%s1045_s24 + $0x8] sm:$0xff] }
  0x30   : > { %v484_v33 = vld [vmem:[%s1045_s24 + $0x10] sm:$0xff]  ;;  %p840_p0 = pnand %p839_p13, %p835_p7 }
  0x31   : > { %v485_v41 = vld [vmem:[%s1045_s24 + $0x18] sm:$0xff] }
  0x99   : > { %v318_v4 = vpop.permute.xlu0 %317 }
  0x9a   : > { %v321_v5 = vmul.f32 %v318_v4, %v313_v3  ;;  %v320_v6 = vmul.f32 %v318_v4, %v312_v2 }
  0x9c   : > { %326 = vxpose.xlu0.b32.start.end [1/1] (short) (narrow) %v321_v5, 32  ;;  %400 = vxpose.xlu1.b32.start.end [1/1] (short) (narrow) %v320_v6, 32 }
 0x140   : > { %v342_v7 = vpop.trf.xlu0  ;;  %v416_v8 = vpop.trf.xlu1 }
 0x141   : > { %697 = vmatmul.msk.f32.vlgmr.msra.gmra.mxu0 %vm358_vm0, %v342_v7 }
 0x142   : > { %501 = vmatpush.msra.mxu0 %v312_v2 }
 0x148   : > { %v343_v9 = vpop.trf.xlu0  ;;  %v417_v10 = vpop.trf.xlu1 }
 0x149   : > { %698 = vmatmul.msk.f32.vlgmr.msra.gmra.mxu3 %vm358_vm0, %v343_v9  ;;  %701 = vmatmul.msk.f32.vlgmr.msrb.gmra.mxu0 %vm358_vm0, %v416_v8 }
 0x14a   : > { %706 = vmatmul.msk.f32.vlgmr.msra.gmra.mxu2 %vm358_vm0, %v343_v9  ;;  %702 = vmatmul.msk.f32.vlgmr.msra.gmra.mxu1 %vm358_vm0, %v417_v10 }
 0x150   : > { %v344_v11 = vpop.trf.xlu0  ;;  %v418_v12 = vpop.trf.xlu1 }
 0x151   : > { %699 = vmatmul.msk.f32.gmra.mxu3 %vm358_vm0, %v344_v11  ;;  %705 = vmatmul.msk.f32.vlgmr.msra.gmra.mxu0 %vm358_vm0, %v342_v7 }
 0x152   : > { %707 = vmatmul.msk.f32.gmra.mxu2 %vm358_vm0, %v344_v11  ;;  %703 = vmatmul.msk.f32.gmra.mxu1 %vm358_vm0, %v418_v12 }
 0x158   : > { %v345_v13 = vpop.trf.xlu0  ;;  %v419_v14 = vpop.trf.xlu1 }
 0x159   : > { %700 = vmatmul.msk.f32.gmra.mxu3 %vm358_vm0, %v345_v13 }
 0x15a   : > { %708 = vmatmul.msk.f32.gmra.mxu2 %vm358_vm0, %v345_v13  ;;  %704 = vmatmul.msk.f32.gmra.mxu1 %vm358_vm0, %v419_v14 }
 0x1be   : > { %v388_v16 = vpop.f32.mrf.mxu0 }
 0x1c6   : > { %v461_v18 = vpop.f32.mrf.mxu0 }
 0x1c7   : > { %v462_v19 = vadd.f32 %v461_v18, %v388_v16  ;;  %v464_v20 = vpop.f32.mrf.mxu1 }
 0x1c9   : > { %v473_v21 = vadd.f32 %v462_v19, %v322_v17 }
 0x1cb   : > { %478 = vst.msk [vmem:[%s1036_s13] sm:$0xff] %vm303_vm1, %v473_v21 }
 0x1cc   : > { %v391_v23 = vpop.f32.mrf.mxu3 }
 0x1cd   : > { %v465_v26 = vadd.f32 %v464_v20, %v391_v23  ;;  %v506_v27 = vpop.f32.mrf.mxu2 }
 0x1ce   : > { %v516_v28 = vadd.f32 %v506_v27, %v483_v22  ;;  %v503_v29 = vpop.f32.mrf.mxu0 }
 0x1cf   : > { %v474_v30 = vadd.f32 %v465_v26, %v323_v24  ;;  %v515_v31 = vadd.f32 %v503_v29, %v482_v25  ;;  %v467_v32 = vpop.f32.mrf.mxu1 }
 0x1d0   : > { %520 = vst.msk [vmem:[%s1045_s24 + $0x8] sm:$0xff] %vm303_vm1, %v516_v28 }
 0x1d1   : > { %479 = vst.msk [vmem:[%s1036_s13 + $0x8] sm:$0xff] %vm303_vm1, %v474_v30 }
 0x1d2   : > { %519 = vst.msk [vmem:[%s1045_s24] sm:$0xff] %vm303_vm1, %v515_v31 }
 0x1d4   : > { %v394_v34 = vpop.f32.mrf.mxu3 }
 0x1d5   : > { %v468_v36 = vadd.f32 %v467_v32, %v394_v34  ;;  %v509_v37 = vpop.f32.mrf.mxu2 }
 0x1d6   : > { %v517_v38 = vadd.f32 %v509_v37, %v484_v33 }
 0x1d7   : > { %v475_v39 = vadd.f32 %v468_v36, %v324_v35  ;;  %v470_v40 = vpop.f32.mrf.mxu1 }
 0x1d8   : > { %521 = vst.msk [vmem:[%s1045_s24 + $0x10] sm:$0xff] %vm303_vm1, %v517_v38 }
 0x1d9   : > { %480 = vst.msk [vmem:[%s1036_s13 + $0x10] sm:$0xff] %vm303_vm1, %v475_v39 }
 0x1dc   : > { %v397_v42 = vpop.f32.mrf.mxu3 }
 0x1dd   : > { %v471_v44 = vadd.f32 %v470_v40, %v397_v42  ;;  %v512_v45 = vpop.f32.mrf.mxu2 }
 0x1de   : > { %v518_v46 = vadd.f32 %v512_v45, %v485_v41 }
 0x1df   : > { %v476_v47 = vadd.f32 %v471_v44, %v325_v43 }
 0x1e0   : > { %522 = vst.msk [vmem:[%s1045_s24 + $0x18] sm:$0xff] %vm303_vm1, %v518_v46 }
 0x1e1   : > { %481 = vst.msk [vmem:[%s1036_s13 + $0x18] sm:$0xff] %vm303_vm1, %v476_v47 }
 0x1e2   : > { %843 = shalt.err (!%p840_p0)
}
 0x1e3   : > { %s902_s21 = smov 128   ;;  %s903_s13 = smov 8  }
 0x1e4   : > { %721 = dma.vmem_to_hbm [thread:$0]  (%p980_p9), %s542_s7, 512, %s544_s8, %s524_s18, %s902_s21, %s902_s21, %s903_s13  }
 0x1e5 PF: > { %s561_s24 = sand.u32 1, %s878_s15   ;;  %p728_p1 = pnand %p687_p12, %p987_p11 }
 0x1e6   : > { %s562_s26 = scalar_lea.sflag [#allocation4], %s561_s24 }
 0x1e7   : > { %p729_p2 = pneg %p728_p1 }
 0x1e9   : > { %873 = dma.done.wait (%p729_p2), %s562_s26, 512  }
 0x1ea   : > { %875 = vsyncadd (%p729_p2), %s562_s26, 4294966784  ;;  %s21_s20 = sadd.s32 1, %s898_s20   ;;  %s1131_s15 = smov %s882_s16 }
 0x1eb   : > { %p18_p3 = scmp.ge.s32.totalorder %s21_s20, 4   ;;  %s1132_s16 = smov %s886_s17 }
 0x1ec   : > { %s1133_s17 = smov %s985_s29  ;;  %s1134_s18 = smov %s894_s19 }
 0x1ed   : > { %s1135_s19 = smov %s1137_s23  ;;  %20 = sbr.rel (!%p18_p3) target bundleno = 6 (0x6), region = 99 }
 0x1f2   :  { %576 = vsyncpa [#allocation3], 1 }
 0x1f3   :  { %578 = vsyncpa [#allocation3 + $0x1], 1 }
 0x1f4   :  { %579 = vsyncpa [#allocation4], 1 }
 0x1f5   :  { %581 = vsyncpa [#allocation4 + $0x1], 1 }

</bundles_post_ra>
